<compile_context>
chip_gen: v7x
topology: tpu7x:2x2x1
jax: 0.10.0
libtpu: 0.0.40
codegen_flags: <defaults>
</compile_context>

<pallas_src>
import jax
import jax.numpy as jnp
import numpy as np
from jax.experimental import pallas as pl
from jax.experimental.pallas import tpu as pltpu


def _round_up(x, m):
    return (x + m - 1) // m * m


def _mixture_kernel(u_ref, it_ref, w1_ref, w2_ref, wta_ref, ub_ref, ib_ref, o_ref):
    # u_ref, it_ref : (TB, D)       bf16 activation tiles
    # w1_ref, w2_ref: (D, D)        bf16, VMEM-resident across grid steps
    # wta_ref       : (D, 2*C*D)    bf16, fused [taste | attention] projection
    # ub_ref, ib_ref, o_ref: (TB, 1) f32
    item = it_ref[...].astype(jnp.float32)                     # (TB, D)
    D = item.shape[1]
    C = wta_ref.shape[1] // (2 * D)
    CD = C * D

    # MixtureComponent MLP: two bias-free linears + ReLU. bf16 MXU inputs,
    # f32 accumulation; ReLU in f32 (v5e has no bf16 VPU).
    h = jnp.dot(u_ref[...], w1_ref[...], preferred_element_type=jnp.float32)
    h = jnp.maximum(h, 0.0).astype(jnp.bfloat16)
    h = jnp.dot(h, w2_ref[...], preferred_element_type=jnp.float32)
    h = jnp.maximum(h, 0.0).astype(jnp.bfloat16)

    # Single fused projection: columns [0, CD) = tastes, [CD, 2*CD) = attention.
    ta = jnp.dot(h, wta_ref[...], preferred_element_type=jnp.float32)  # (TB, 2*C*D)

    # Per-component dot products against the item embedding, kept as (TB, 1)
    # columns (no concatenation of 1-lane slices into a lane-sparse (TB, C)).
    # Lane reductions go to the XLU slot; with small static C this unrolls fully.
    prefs, logits = [], []
    for c in range(C):
        t_c = ta[:, c * D:(c + 1) * D]
        a_c = ta[:, CD + c * D:CD + (c + 1) * D]
        prefs.append(jnp.sum(t_c * item, axis=1, keepdims=True))
        logits.append(jnp.sum(a_c * item, axis=1, keepdims=True))

    # Softmax over the C components, fully unrolled (C is a small static const).
    m = logits[0]
    for c in range(1, C):
        m = jnp.maximum(m, logits[c])
    exps = [jnp.exp(l - m) for l in logits]
    denom = exps[0]
    for c in range(1, C):
        denom = denom + exps[c]
    inv = pl.reciprocal(denom, approx=True)

    weighted = exps[0] * prefs[0]
    for c in range(1, C):
        weighted = weighted + exps[c] * prefs[c]
    weighted = weighted * inv                    # (TB, 1)

    o_ref[...] = weighted + ub_ref[...] + ib_ref[...]


def nonlinear_mixture_forward(user_ids, item_ids, params, *, batch_tile=512):
    """Embedding gathers (glue) in plain JAX; hot path in the Pallas kernel."""
    # TODO(synk): fuse these gathers into the kernel (scalar-prefetched ids +
    # in-kernel row DMAs from HBM tables) to remove the extra HBM round trip.
    u_emb = jnp.take(params["user_emb"], user_ids, axis=0).astype(jnp.bfloat16)
    i_emb = jnp.take(params["item_emb"], item_ids, axis=0).astype(jnp.bfloat16)
    u_bias = jnp.take(params["user_bias"], user_ids, axis=0)   # (B, 1) f32
    i_bias = jnp.take(params["item_bias"], item_ids, axis=0)   # (B, 1) f32

    # bf16 MXU weight inputs; Wt and Wa fused into one projection matrix.
    w1 = params["w1_t"].astype(jnp.bfloat16)
    w2 = params["w2_t"].astype(jnp.bfloat16)
    wta = jnp.concatenate([params["wt_t"], params["wa_t"]], axis=1).astype(jnp.bfloat16)

    B, D = u_emb.shape
    C = params["wt_t"].shape[1] // D

    # Batch tile: multiple of 8 sublanes, capped so it always fits per-generation
    # VMEM; pad ragged batches (padded rows are computed and then sliced away).
    TB = min(batch_tile, _round_up(B, 8))
    Bp = _round_up(B, TB)
    if Bp != B:
        pad = ((0, Bp - B), (0, 0))
        u_emb, i_emb = jnp.pad(u_emb, pad), jnp.pad(i_emb, pad)
        u_bias, i_bias = jnp.pad(u_bias, pad), jnp.pad(i_bias, pad)

    # Rough VMEM budget: resident weights + double-buffered activation tiles +
    # f32 intermediates; cap leaves headroom under v7x's 64 MiB physical VMEM.
    weight_bytes = (2 * D * D + 2 * C * D * D) * 2            # bf16 weights
    tile_bytes = 2 * TB * D * 2 + 3 * TB * 4                  # u/it + biases + out
    interm_bytes = TB * (2 * C * D + 2 * D) * 4               # ta + f32 temps
    vmem_limit = int(min(48 * 2**20,
                         max(16 * 2**20,
                             2 * weight_bytes + 4 * tile_bytes + 2 * interm_bytes)))

    out = pl.pallas_call(
        _mixture_kernel,
        out_shape=jax.ShapeDtypeStruct((Bp, 1), jnp.float32),
        grid=(Bp // TB,),
        in_specs=[
            pl.BlockSpec((TB, D), lambda i: (i, 0)),           # user emb tile
            pl.BlockSpec((TB, D), lambda i: (i, 0)),           # item emb tile
            pl.BlockSpec((D, D), lambda i: (0, 0)),            # W1  (resident)
            pl.BlockSpec((D, D), lambda i: (0, 0)),            # W2  (resident)
            pl.BlockSpec((D, 2 * C * D), lambda i: (0, 0)),    # [Wt|Wa] (resident)
            pl.BlockSpec((TB, 1), lambda i: (i, 0)),           # user bias tile
            pl.BlockSpec((TB, 1), lambda i: (i, 0)),           # item bias tile
        ],
        out_specs=pl.BlockSpec((TB, 1), lambda i: (i, 0)),
        compiler_params=pltpu.CompilerParams(
            dimension_semantics=("parallel",),   # shard batch tiles across TCs (v7x)
            vmem_limit_bytes=vmem_limit),
    )(u_emb, i_emb, w1, w2, wta, u_bias, i_bias)

    return out[:B, 0]   # (B,) — matches .squeeze()


def _reference_forward(user_ids, item_ids, params):
    """Pure-JAX reference with the same bf16 input casts the kernel uses."""
    f32 = jnp.float32
    u = jnp.take(params["user_emb"], user_ids, axis=0).astype(jnp.bfloat16).astype(f32)
    it = jnp.take(params["item_emb"], item_ids, axis=0).astype(jnp.bfloat16).astype(f32)
    w1 = params["w1_t"].astype(jnp.bfloat16).astype(f32)
    w2 = params["w2_t"].astype(jnp.bfloat16).astype(f32)
    wt = params["wt_t"].astype(jnp.bfloat16).astype(f32)
    wa = params["wa_t"].astype(jnp.bfloat16).astype(f32)

    h = jax.nn.relu(u @ w1).astype(jnp.bfloat16).astype(f32)
    h = jax.nn.relu(h @ w2).astype(jnp.bfloat16).astype(f32)

    B, D = it.shape
    C = wt.shape[1] // D
    tastes = (h @ wt).reshape(B, C, D)
    attn = (h @ wa).reshape(B, C, D)
    logits = jnp.sum(attn * it[:, None, :], axis=2)
    prefs = jnp.sum(tastes * it[:, None, :], axis=2)
    sm = jax.nn.softmax(logits, axis=1)
    out = jnp.sum(sm * prefs, axis=1)
    ub = jnp.take(params["user_bias"], user_ids, axis=0)[:, 0]
    ib = jnp.take(params["item_bias"], item_ids, axis=0)[:, 0]
    return out + ub + ib


def init_params(key, num_users, num_items, embedding_dim, num_components):
    D, C = embedding_dim, num_components
    ks = jax.random.split(key, 6)
    bound = 1.0 / jnp.sqrt(D)
    return {
        # nn.Embedding default init: N(0, 1)
        "user_emb": jax.random.normal(ks[0], (num_users, D), jnp.float32),
        "item_emb": jax.random.normal(ks[1], (num_items, D), jnp.float32),
        # ZeroEmbedding: zero-initialized bias tables
        "user_bias": jnp.zeros((num_users, 1), jnp.float32),
        "item_bias": jnp.zeros((num_items, 1), jnp.float32),
        # nn.Linear weights are (out, in); stored pre-transposed as (in, out)
        "w1_t": jax.random.uniform(ks[2], (D, D), jnp.float32, -bound, bound),
        "w2_t": jax.random.uniform(ks[3], (D, D), jnp.float32, -bound, bound),
        "wt_t": jax.random.uniform(ks[4], (D, D * C), jnp.float32, -bound, bound),
        "wa_t": jax.random.uniform(ks[5], (D, D * C), jnp.float32, -bound, bound),
    }


if __name__ == "__main__":
    num_users, num_items = 16, 24
    embedding_dim, num_components = 32, 4
    batch = 8

    key = jax.random.PRNGKey(0)
    kp, ku, ki = jax.random.split(key, 3)
    params = init_params(kp, num_users, num_items, embedding_dim, num_components)
    user_ids = jax.random.randint(ku, (batch,), 0, num_users, dtype=jnp.int32)
    item_ids = jax.random.randint(ki, (batch,), 0, num_items, dtype=jnp.int32)

    preds = nonlinear_mixture_forward(user_ids, item_ids, params)
    jax.block_until_ready(preds)
    assert preds.shape == (batch,) and preds.dtype == jnp.float32

    ref = _reference_forward(user_ids, item_ids, params)
    np.testing.assert_allclose(np.asarray(preds), np.asarray(ref),
                               rtol=1e-2, atol=1e-2)

    # Second check: multi-tile grid + ragged-batch padding path.
    batch2 = 200
    ku2, ki2 = jax.random.split(jax.random.PRNGKey(1), 2)
    uids2 = jax.random.randint(ku2, (batch2,), 0, num_users, dtype=jnp.int32)
    iids2 = jax.random.randint(ki2, (batch2,), 0, num_items, dtype=jnp.int32)
    preds2 = nonlinear_mixture_forward(uids2, iids2, params, batch_tile=64)
    jax.block_until_ready(preds2)
    ref2 = _reference_forward(uids2, iids2, params)
    np.testing.assert_allclose(np.asarray(preds2), np.asarray(ref2),
                               rtol=1e-2, atol=1e-2)

    print("KERNEL_OK")
</pallas_src>

<mosaic_0001>
module attributes {stable_mosaic.version = 11 : i64} {
  func.func @_mixture_kernel(%arg0: i32, %arg1: memref<8x32xbf16, #tpu.memory_space<vmem>>, %arg2: memref<8x32xbf16, #tpu.memory_space<vmem>>, %arg3: memref<32x32xbf16, #tpu.memory_space<vmem>>, %arg4: memref<32x32xbf16, #tpu.memory_space<vmem>>, %arg5: memref<32x256xbf16, #tpu.memory_space<vmem>>, %arg6: memref<8x1xf32, #tpu.memory_space<vmem>>, %arg7: memref<8x1xf32, #tpu.memory_space<vmem>>, %arg8: memref<8x1xf32, #tpu.memory_space<vmem>>) attributes {dimension_semantics = [#tpu.dimension_semantics<parallel>], iteration_bounds = array<i64: 1>, scalar_prefetch = 0 : i64, scratch_operands = 0 : i64, tpu.core_type = #tpu.core_type<tc>, window_params = [{transform_indices = @transform_0, window_bounds = array<i64: 8, 32>}, {transform_indices = @transform_1, window_bounds = array<i64: 8, 32>}, {pipeline_mode = #tpu.pipeline_mode<synchronous>, transform_indices = @transform_2, window_bounds = array<i64: 32, 32>}, {pipeline_mode = #tpu.pipeline_mode<synchronous>, transform_indices = @transform_3, window_bounds = array<i64: 32, 32>}, {pipeline_mode = #tpu.pipeline_mode<synchronous>, transform_indices = @transform_4, window_bounds = array<i64: 32, 256>}, {transform_indices = @transform_5, window_bounds = array<i64: 8, 1>}, {transform_indices = @transform_6, window_bounds = array<i64: 8, 1>}, {transform_indices = @transform_7, window_bounds = array<i64: 8, 1>}]} {
    %c0 = arith.constant 0 : index
    %c0_0 = arith.constant 0 : index
    %0 = vector.load %arg2[%c0, %c0_0] : memref<8x32xbf16, #tpu.memory_space<vmem>>, vector<8x32xbf16>
    %1 = arith.extf %0 : vector<8x32xbf16> to vector<8x32xf32>
    %c0_1 = arith.constant 0 : index
    %c0_2 = arith.constant 0 : index
    %2 = vector.load %arg1[%c0_1, %c0_2] : memref<8x32xbf16, #tpu.memory_space<vmem>>, vector<8x32xbf16>
    %c0_3 = arith.constant 0 : index
    %c0_4 = arith.constant 0 : index
    %3 = vector.load %arg3[%c0_3, %c0_4] : memref<32x32xbf16, #tpu.memory_space<vmem>>, vector<32x32xbf16>
    %cst = arith.constant dense<0.000000e+00> : vector<8x32xf32>
    %4 = tpu.matmul %2, %3, %cst {dimension_numbers = #tpu.dot_dimension_numbers<[1], [0], [0], [1], [0, 0, 1, 1], [], []>} : vector<8x32xbf16>, vector<32x32xbf16>, vector<8x32xf32> -> vector<8x32xf32>
    %cst_5 = arith.constant 0.000000e+00 : f32
    %5 = vector.broadcast %cst_5 : f32 to vector<8x32xf32>
    %6 = arith.maximumf %4, %5 : vector<8x32xf32>
    %7 = arith.truncf %6 : vector<8x32xf32> to vector<8x32xbf16>
    %c0_6 = arith.constant 0 : index
    %c0_7 = arith.constant 0 : index
    %8 = vector.load %arg4[%c0_6, %c0_7] : memref<32x32xbf16, #tpu.memory_space<vmem>>, vector<32x32xbf16>
    %cst_8 = arith.constant dense<0.000000e+00> : vector<8x32xf32>
    %9 = tpu.matmul %7, %8, %cst_8 {dimension_numbers = #tpu.dot_dimension_numbers<[1], [0], [0], [1], [0, 0, 1, 1], [], []>} : vector<8x32xbf16>, vector<32x32xbf16>, vector<8x32xf32> -> vector<8x32xf32>
    %cst_9 = arith.constant 0.000000e+00 : f32
    %10 = vector.broadcast %cst_9 : f32 to vector<8x32xf32>
    %11 = arith.maximumf %9, %10 : vector<8x32xf32>
    %12 = arith.truncf %11 : vector<8x32xf32> to vector<8x32xbf16>
    %c0_10 = arith.constant 0 : index
    %c0_11 = arith.constant 0 : index
    %13 = vector.load %arg5[%c0_10, %c0_11] : memref<32x256xbf16, #tpu.memory_space<vmem>>, vector<32x256xbf16>
    %cst_12 = arith.constant dense<0.000000e+00> : vector<8x256xf32>
    %14 = tpu.matmul %12, %13, %cst_12 {dimension_numbers = #tpu.dot_dimension_numbers<[1], [0], [0], [1], [0, 0, 1, 1], [], []>} : vector<8x32xbf16>, vector<32x256xbf16>, vector<8x256xf32> -> vector<8x256xf32>
    %15 = vector.extract_strided_slice %14 {offsets = [0, 0], sizes = [8, 32], strides = [1, 1]} : vector<8x256xf32> to vector<8x32xf32>
    %16 = vector.extract_strided_slice %14 {offsets = [0, 128], sizes = [8, 32], strides = [1, 1]} : vector<8x256xf32> to vector<8x32xf32>
    %17 = arith.mulf %15, %1 : vector<8x32xf32>
    %cst_13 = arith.constant dense<0.000000e+00> : vector<8xf32>
    %18 = vector.multi_reduction <add>, %17, %cst_13 [1] : vector<8x32xf32> to vector<8xf32>
    %19 = vector.shape_cast %18 : vector<8xf32> to vector<8x1xf32>
    %20 = arith.mulf %16, %1 : vector<8x32xf32>
    %cst_14 = arith.constant dense<0.000000e+00> : vector<8xf32>
    %21 = vector.multi_reduction <add>, %20, %cst_14 [1] : vector<8x32xf32> to vector<8xf32>
    %22 = vector.shape_cast %21 : vector<8xf32> to vector<8x1xf32>
    %23 = vector.extract_strided_slice %14 {offsets = [0, 32], sizes = [8, 32], strides = [1, 1]} : vector<8x256xf32> to vector<8x32xf32>
    %24 = vector.extract_strided_slice %14 {offsets = [0, 160], sizes = [8, 32], strides = [1, 1]} : vector<8x256xf32> to vector<8x32xf32>
    %25 = arith.mulf %23, %1 : vector<8x32xf32>
    %cst_15 = arith.constant dense<0.000000e+00> : vector<8xf32>
    %26 = vector.multi_reduction <add>, %25, %cst_15 [1] : vector<8x32xf32> to vector<8xf32>
    %27 = vector.shape_cast %26 : vector<8xf32> to vector<8x1xf32>
    %28 = arith.mulf %24, %1 : vector<8x32xf32>
    %cst_16 = arith.constant dense<0.000000e+00> : vector<8xf32>
    %29 = vector.multi_reduction <add>, %28, %cst_16 [1] : vector<8x32xf32> to vector<8xf32>
    %30 = vector.shape_cast %29 : vector<8xf32> to vector<8x1xf32>
    %31 = vector.extract_strided_slice %14 {offsets = [0, 64], sizes = [8, 32], strides = [1, 1]} : vector<8x256xf32> to vector<8x32xf32>
    %32 = vector.extract_strided_slice %14 {offsets = [0, 192], sizes = [8, 32], strides = [1, 1]} : vector<8x256xf32> to vector<8x32xf32>
    %33 = arith.mulf %31, %1 : vector<8x32xf32>
    %cst_17 = arith.constant dense<0.000000e+00> : vector<8xf32>
    %34 = vector.multi_reduction <add>, %33, %cst_17 [1] : vector<8x32xf32> to vector<8xf32>
    %35 = vector.shape_cast %34 : vector<8xf32> to vector<8x1xf32>
    %36 = arith.mulf %32, %1 : vector<8x32xf32>
    %cst_18 = arith.constant dense<0.000000e+00> : vector<8xf32>
    %37 = vector.multi_reduction <add>, %36, %cst_18 [1] : vector<8x32xf32> to vector<8xf32>
    %38 = vector.shape_cast %37 : vector<8xf32> to vector<8x1xf32>
    %39 = vector.extract_strided_slice %14 {offsets = [0, 96], sizes = [8, 32], strides = [1, 1]} : vector<8x256xf32> to vector<8x32xf32>
    %40 = vector.extract_strided_slice %14 {offsets = [0, 224], sizes = [8, 32], strides = [1, 1]} : vector<8x256xf32> to vector<8x32xf32>
    %41 = arith.mulf %39, %1 : vector<8x32xf32>
    %cst_19 = arith.constant dense<0.000000e+00> : vector<8xf32>
    %42 = vector.multi_reduction <add>, %41, %cst_19 [1] : vector<8x32xf32> to vector<8xf32>
    %43 = vector.shape_cast %42 : vector<8xf32> to vector<8x1xf32>
    %44 = arith.mulf %40, %1 : vector<8x32xf32>
    %cst_20 = arith.constant dense<0.000000e+00> : vector<8xf32>
    %45 = vector.multi_reduction <add>, %44, %cst_20 [1] : vector<8x32xf32> to vector<8xf32>
    %46 = vector.shape_cast %45 : vector<8xf32> to vector<8x1xf32>
    %47 = arith.maximumf %22, %30 : vector<8x1xf32>
    %48 = arith.maximumf %47, %38 : vector<8x1xf32>
    %49 = arith.maximumf %48, %46 : vector<8x1xf32>
    %50 = arith.subf %22, %49 : vector<8x1xf32>
    %51 = math.exp %50 : vector<8x1xf32>
    %52 = arith.subf %30, %49 : vector<8x1xf32>
    %53 = math.exp %52 : vector<8x1xf32>
    %54 = arith.subf %38, %49 : vector<8x1xf32>
    %55 = math.exp %54 : vector<8x1xf32>
    %56 = arith.subf %46, %49 : vector<8x1xf32>
    %57 = math.exp %56 : vector<8x1xf32>
    %58 = arith.addf %51, %53 : vector<8x1xf32>
    %59 = arith.addf %58, %55 : vector<8x1xf32>
    %60 = arith.addf %59, %57 : vector<8x1xf32>
    %61 = tpu.reciprocal %60 {approx = true} : vector<8x1xf32> -> vector<8x1xf32>
    %62 = arith.mulf %51, %19 : vector<8x1xf32>
    %63 = arith.mulf %53, %27 : vector<8x1xf32>
    %64 = arith.addf %62, %63 : vector<8x1xf32>
    %65 = arith.mulf %55, %35 : vector<8x1xf32>
    %66 = arith.addf %64, %65 : vector<8x1xf32>
    %67 = arith.mulf %57, %43 : vector<8x1xf32>
    %68 = arith.addf %66, %67 : vector<8x1xf32>
    %69 = arith.mulf %68, %61 : vector<8x1xf32>
    %c0_21 = arith.constant 0 : index
    %c0_22 = arith.constant 0 : index
    %70 = vector.load %arg6[%c0_21, %c0_22] : memref<8x1xf32, #tpu.memory_space<vmem>>, vector<8x1xf32>
    %71 = arith.addf %69, %70 : vector<8x1xf32>
    %c0_23 = arith.constant 0 : index
    %c0_24 = arith.constant 0 : index
    %72 = vector.load %arg7[%c0_23, %c0_24] : memref<8x1xf32, #tpu.memory_space<vmem>>, vector<8x1xf32>
    %73 = arith.addf %71, %72 : vector<8x1xf32>
    %c0_25 = arith.constant 0 : index
    %c0_26 = arith.constant 0 : index
    %74 = vector.load %arg8[%c0_25, %c0_26] : memref<8x1xf32, #tpu.memory_space<vmem>>, vector<8x1xf32>
    tpu.vector_store %arg8[%c0_25, %c0_26], %73 {strides = array<i32>} : memref<8x1xf32, #tpu.memory_space<vmem>>, vector<8x1xf32>,
    return
  }
  func.func @transform_0(%arg0: i32) -> (i32, i32) {
    %c0_i32 = arith.constant 0 : i32
    %c0_i32_0 = arith.constant 0 : i32
    return %arg0, %c0_i32 : i32, i32
  }
  func.func @transform_1(%arg0: i32) -> (i32, i32) {
    %c0_i32 = arith.constant 0 : i32
    %c0_i32_0 = arith.constant 0 : i32
    return %arg0, %c0_i32 : i32, i32
  }
  func.func @transform_2(%arg0: i32) -> (i32, i32) {
    %c0_i32 = arith.constant 0 : i32
    %c0_i32_0 = arith.constant 0 : i32
    %c0_i32_1 = arith.constant 0 : i32
    return %c0_i32, %c0_i32_0 : i32, i32
  }
  func.func @transform_3(%arg0: i32) -> (i32, i32) {
    %c0_i32 = arith.constant 0 : i32
    %c0_i32_0 = arith.constant 0 : i32
    %c0_i32_1 = arith.constant 0 : i32
    return %c0_i32, %c0_i32_0 : i32, i32
  }
  func.func @transform_4(%arg0: i32) -> (i32, i32) {
    %c0_i32 = arith.constant 0 : i32
    %c0_i32_0 = arith.constant 0 : i32
    %c0_i32_1 = arith.constant 0 : i32
    return %c0_i32, %c0_i32_0 : i32, i32
  }
  func.func @transform_5(%arg0: i32) -> (i32, i32) {
    %c0_i32 = arith.constant 0 : i32
    %c0_i32_0 = arith.constant 0 : i32
    return %arg0, %c0_i32 : i32, i32
  }
  func.func @transform_6(%arg0: i32) -> (i32, i32) {
    %c0_i32 = arith.constant 0 : i32
    %c0_i32_0 = arith.constant 0 : i32
    return %arg0, %c0_i32 : i32, i32
  }
  func.func @transform_7(%arg0: i32) -> (i32, i32) {
    %c0_i32 = arith.constant 0 : i32
    %c0_i32_0 = arith.constant 0 : i32
    return %arg0, %c0_i32 : i32, i32
  }
}

</mosaic_0001>

<bundles_post_ra>
// kernel: tpu_custom_call.1
= control target key start
LH: loop header
LB: loop body
LE: loop exit
PB: predicated region body
PF: predicated region fallthrough
CT: control target
= control target key end

     0   :  { %12 = vsyncpa [#allocation3], 0  ;;  %s674_s0 = inlined_call_operand.hbm [shape: bf16[8,32], index: 0, kind: input, shape index: {}]   ;;  %s675_s1 = inlined_call_operand.hbm [shape: bf16[8,32], index: 1, kind: input, shape index: {}]   ;;  %s676_s2 = inlined_call_operand.hbm [shape: bf16[32,32], index: 2, kind: input, shape index: {}]   ;;  %s677_s3 = inlined_call_operand.hbm [shape: bf16[32,32], index: 3, kind: input, shape index: {}]   ;;  %s678_s4 = inlined_call_operand.vmem [shape: bf16[32,256], index: 4, kind: input, shape index: {}]   ;;  %s679_s5 = inlined_call_operand.vmem [shape: f32[8,1], index: 5, kind: input, shape index: {}]   ;;  %s680_s6 = inlined_call_operand.vmem [shape: f32[8,1], index: 6, kind: input, shape index: {}]   ;;  %s681_s7 = inlined_call_operand.vmem [shape: f32[8,1], index: 7, kind: output, shape index: {}]  }
   0x1   :  { %13 = vsyncpa [#allocation5], 0 }
   0x2   :  { %14 = vsyncpa [#allocation8], 0  ;;  %s536_s24 = smov [#allocation4]   ;;  %s537_s26 = smov [#allocation2]  }
   0x3   :  { %s31_s25 = sshll.u32 %s536_s24, 4  ;;  %s21_s27 = sshll.u32 %s537_s26, 4  ;;  %s32_s25 = int_to_ptr.vmem [resolvable:$true] %s31_s25  ;;  %s22_s27 = int_to_ptr.vmem [resolvable:$true] %s21_s27 }
   0x4   :  { %s442_s30 = scalar_lea.hbm %s675_s1, 64 }
   0x5   :  { %p443_p0 = scmp.ne.s32.totalorder %s675_s1, %s442_s30  ;;  %p446_p1 = scmp.lt.u32.totalorder %s442_s30, %s675_s1 }
   0x7   :  { %p448_p2 = pnand %p446_p1, %p443_p0 }
   0x9   :  { %451 = shalt.err (!%p448_p2)
}
   0xa   :  { %s452_s12 = scalar_lea.vmem %s32_s25, 64  ;;  %p457_p4 = scmp.lt.s32.totalorder %s32_s25, %s32_s25 }
   0xb   :  { %p453_p3 = scmp.ne.s32.totalorder %s32_s25, %s452_s12  ;;  %p458_p5 = scmp.lt.s32.totalorder %s452_s12, %s452_s12 }
   0xd   :  { %p459_p6 = por %p458_p5, %p457_p4 }
   0xf   :  { %p460_p7 = pnand %p459_p6, %p453_p3 }
  0x11   :  { %463 = shalt.err (!%p460_p7)
}
  0x12   :  { %34 = dma.hbm_to_vmem [thread:$0]  %s675_s1, 64, %s32_s25, [#allocation5]  }
  0x13   :  { %s464_s17 = scalar_lea.hbm %s674_s0, 64 }
  0x14   :  { %p465_p8 = scmp.ne.s32.totalorder %s674_s0, %s464_s17  ;;  %p468_p9 = scmp.lt.u32.totalorder %s464_s17, %s674_s0 }
  0x16   :  { %p470_p10 = pnand %p468_p9, %p465_p8 }
  0x18   :  { %473 = shalt.err (!%p470_p10)
}
  0x19   :  { %s474_s22 = scalar_lea.vmem %s22_s27, 64  ;;  %p479_p12 = scmp.lt.s32.totalorder %s22_s27, %s22_s27 }
  0x1a   :  { %p475_p11 = scmp.ne.s32.totalorder %s22_s27, %s474_s22  ;;  %p480_p13 = scmp.lt.s32.totalorder %s474_s22, %s474_s22 }
  0x1c   :  { %p481_p0 = por %p480_p13, %p479_p12 }
  0x1e   :  { %p482_p1 = pnand %p481_p0, %p475_p11 }
  0x20   :  { %485 = shalt.err (!%p482_p1)
}
  0x21   :  { %24 = dma.hbm_to_vmem [thread:$0]  %s674_s0, 64, %s22_s27, [#allocation3]  }
  0x22   :  { %s538_s24 = smov [#allocation6]   ;;  %s486_s29 = scalar_lea.hbm %s676_s2, 256 }
  0x23   :  { %s40_s25 = sshll.u32 %s538_s24, 4  ;;  %p487_p2 = scmp.ne.s32.totalorder %s676_s2, %s486_s29  ;;  %s41_s25 = int_to_ptr.vmem [resolvable:$true] %s40_s25 }
  0x24   :  { %p490_p3 = scmp.lt.u32.totalorder %s486_s29, %s676_s2 }
  0x26   :  { %p492_p4 = pnand %p490_p3, %p487_p2 }
  0x28   :  { %495 = shalt.err (!%p492_p4)
}
  0x29   :  { %s496_s11 = scalar_lea.vmem %s41_s25, 256  ;;  %p501_p6 = scmp.lt.s32.totalorder %s41_s25, %s41_s25 }
  0x2a   :  { %p497_p5 = scmp.ne.s32.totalorder %s41_s25, %s496_s11  ;;  %p502_p7 = scmp.lt.s32.totalorder %s496_s11, %s496_s11 }
  0x2c   :  { %p503_p8 = por %p502_p7, %p501_p6 }
  0x2e   :  { %p504_p9 = pnand %p503_p8, %p497_p5 }
  0x30   :  { %507 = shalt.err (!%p504_p9)
}
  0x31   :  { %s539_s0 = smov 64   ;;  %s540_s27 = smov 4  }
  0x32   :  { %46 = dma.hbm_to_vmem [thread:$0]  %s676_s2, 256, %s41_s25, [#allocation5], %s539_s0, %s539_s0, %s540_s27  }
  0x33   :  { %s541_s14 = smov [#allocation7]   ;;  %s508_s18 = scalar_lea.hbm %s677_s3, 256 }
  0x34   :  { %s52_s15 = sshll.u32 %s541_s14, 4  ;;  %p509_p10 = scmp.ne.s32.totalorder %s677_s3, %s508_s18  ;;  %s53_s15 = int_to_ptr.vmem [resolvable:$true] %s52_s15 }
  0x35   :  { %p512_p11 = scmp.lt.u32.totalorder %s508_s18, %s677_s3 }
  0x37   :  { %p514_p12 = pnand %p512_p11, %p509_p10 }
  0x39   :  { %517 = shalt.err (!%p514_p12)
}
  0x3a   :  { %s518_s1 = scalar_lea.vmem %s53_s15, 256  ;;  %p523_p0 = scmp.lt.s32.totalorder %s53_s15, %s53_s15 }
  0x3b   :  { %p519_p13 = scmp.ne.s32.totalorder %s53_s15, %s518_s1  ;;  %p524_p1 = scmp.lt.s32.totalorder %s518_s1, %s518_s1 }
  0x3d   :  { %p525_p2 = por %p524_p1, %p523_p0 }
  0x3f   :  { %p526_p3 = pnand %p525_p2, %p519_p13 }
  0x41   :  { %529 = shalt.err (!%p526_p3)
}
  0x42   :  { %58 = dma.hbm_to_vmem [thread:$0]  %s677_s3, 256, %s53_s15, [#allocation8], %s539_s0, %s539_s0, %s540_s27  }
  0x43   :  { %530 = dma.done.wait [#allocation3], 64  }
  0x44   :  { %531 = vsyncadd [#allocation3], 4294967232 }
  0x45   :  { %532 = dma.done.wait [#allocation5], 320  }
  0x46   :  { %533 = vsyncadd [#allocation5], 4294966976 }
  0x47   :  { %534 = dma.done.wait [#allocation8], 256  }
  0x48   :  { %535 = vsyncadd [#allocation8], 4294967040  ;;  %v542_v0 = vmov 0.0   ;;  %vm543_vm0 = vmmov 0   ;;  %v422_v1 = vld [vmem:[#allocation6] sm:$0xff]   ;;  %v423_v2 = vld [vmem:[#allocation6 + $0x8] sm:$0xff]  }
  0x49   :  { %395 = vmatprep.subr.bf16.mxu0 %v542_v0  ;;  %399 = vmatprep.mubr.msk.bf16.mxu0 %vm543_vm0, %v542_v0  ;;  %v424_v3 = vld [vmem:[#allocation7] sm:$0xff]   ;;  %v80_v4 = vld [vmem:[#allocation2] sm:$0xf]  ;;  %vm97_vm1 = vcmask 261120   ;;  %v428_v7 = vld [vmem:[%s678_s4 + $0x4] ss:$8 sps:$4 sm:$0xff]  }
  0x4a   :  { %403 = vmatprep.subr.bf16.mxu1 %v542_v0  ;;  %407 = vmatprep.mubr.msk.bf16.mxu1 %vm543_vm0, %v542_v0  ;;  %v425_v5 = vld [vmem:[#allocation7 + $0x8] sm:$0xff]   ;;  %v431_v14 = vld [vmem:[%s678_s4 + $0x14] ss:$8 sps:$4 sm:$0xff]   ;;  %v429_v15 = vld [vmem:[%s678_s4 + $0x10] ss:$8 sps:$4 sm:$0xff]   ;;  %v544_v16 = vmov 0  }
  0x4b   :  { %396 = vmatpush3.bf16.msra.mxu0 %v422_v1  ;;  %404 = vmatpush3.bf16.msra.mxu1 %v424_v3  ;;  %v426_v6 = vld [vmem:[%s678_s4] ss:$8 sps:$4 sm:$0xff]   ;;  %v78_v17 = vld [vmem:[#allocation4] sm:$0xf]  ;;  %s545_s9 = smov 32   ;;  %s546_s10 = smov 96  }
  0x4c   :  { %397 = vmatprep.subr.bf16.mxu0 %v542_v0  ;;  %405 = vmatprep.subr.bf16.mxu1 %v542_v0  ;;  %v79_v18 = vunpack.c.l.bf16 %v78_v17  ;;  %vm369_vm2 = vcmask 7168  }
  0x4e   :  { %281 = vrot.lane.b32.xlu0 %v79_v18, %s545_s9  ;;  %319 = vrot.lane.b32.xlu1 %v79_v18, %s546_s10 }
  0x4f   :  { %398 = vmatpush3.bf16.msra.mxu0 %v423_v2  ;;  %406 = vmatpush3.bf16.msra.mxu1 %v425_v5 }
  0x50   :  { %231 = vmatprep.subr.bf16.mxu0 %v428_v7 }
  0x52   :  { %400 = vmatmul.mubr.msk.bf16.vlgmr.msra.gmra.mrb[0].mxu0 %vm97_vm1, %v80_v4  ;;  %300 = vrot.lane.b32.xlu0 %v79_v18, %s539_s0 }
  0x53   :  { %232 = vmatpush1.bf16.msra.mxu0 %v426_v6  ;;  %263 = vmatprep.mubr.bf16.mxu0 %v544_v16 }
  0x54   :  { %233 = vmatprep.subr.bf16.mxu0 %v431_v14 }
  0x57   :  { %234 = vmatpush1.bf16.msra.mxu0 %v429_v15 }
  0xc0   :  { %v282_v25 = vpop.permute.xlu0 %281  ;;  %v320_v32 = vpop.permute.xlu1 %319 }
  0xc4   :  { %v301_v26 = vpop.permute.xlu0 %300 }
 0x125   :  { %v135_v8 = vpop.f32.mrb[0].mxu0 }
 0x126   :  { %v141_v9 = vmax.f32 %v135_v8, 0.0  ;;  %v401_v10 = vpop.f32.mrb[1].mxu0 }
 0x127   :  { %v138_v11 = vpop.f32.mrb[2].mxu0 }
 0x128   :  { %v142_v12 = vpack.c.bf16 %v141_v9, %v141_v9  ;;  %v402_v13 = vpop.f32.mrb[3].mxu0 }
 0x12a   :  { %408 = vmatmul.mubr.msk.bf16.vlgmr.msra.gmra.mrb[0].mxu1 %vm97_vm1, %v142_v12 }
 0x1fd   :  { %v196_v19 = vpop.f32.mrb[0].mxu1 }
 0x1fe   :  { %v202_v20 = vmax.f32 %v196_v19, 0.0  ;;  %v409_v21 = vpop.f32.mrb[1].mxu1 }
 0x1ff   :  { %v199_v22 = vpop.f32.mrb[2].mxu1 }
 0x200   :  { %v203_v23 = vpack.c.bf16 %v202_v20, %v202_v20  ;;  %v410_v24 = vpop.f32.mrb[3].mxu1 }
 0x201   :  { %v365_v24 = vld [vmem:[%s679_s5] sm:$0xff] }
 0x202   :  { %388 = vmatmul.mubr.msk.bf16.vlgmr.msra.gmra.mrb[4].mxu0 %vm97_vm1, %v203_v23 }
 0x2d5   :  { %v265_v27 = vpop.f32.mrb[4].mxu0 }
 0x2d6   :  { %v267_v28 = vpop.f32.mrb[5].mxu0  ;;  %v284_v35 = vmul.f32 %v282_v25, %v265_v27  ;;  %v303_v36 = vmul.f32 %v301_v26, %v265_v27  ;;  %v322_v37 = vmul.f32 %v320_v32, %v265_v27  ;;  %v272_v38 = vmul.f32 %v265_v27, %v79_v18 }
 0x2d7   :  { %v269_v29 = vpop.f32.mrb[6].mxu0  ;;  %v292_v30 = vmul.f32 %v282_v25, %v267_v28  ;;  %v311_v31 = vmul.f32 %v301_v26, %v267_v28  ;;  %v330_v34 = vmul.f32 %v320_v32, %v267_v28  ;;  %v276_v40 = vmul.f32 %v267_v28, %v79_v18  ;;  %v367_v26 = vld [vmem:[%s680_s6] sm:$0xff] }
 0x2d8   :  { %v270_v33 = vpop.f32.mrb[7].mxu0  ;;  %v273_v39 = vsel %vm97_vm1, %v272_v38, 0.0 }
 0x2d9   :  { %294 = vrot.lane.b32.xlu1 %v292_v30, %s546_s10  ;;  %313 = vrot.lane.b32.xlu0 %v311_v31, %s539_s0  ;;  %v277_v41 = vsel %vm97_vm1, %v276_v40, 0.0 }
 0x2dd   :  { %332 = vrot.lane.b32.xlu1 %v330_v34, %s545_s9 }
 0x2e1   :  { %286 = vrot.lane.b32.xlu1 %v284_v35, %s546_s10 }
 0x2e5   :  { %305 = vrot.lane.b32.xlu1 %v303_v36, %s539_s0 }
 0x2e9   :  { %324 = vrot.lane.b32.xlu1 %v322_v37, %s545_s9 }
 0x2f8   :  { %274 = vadd.xlane.f32.xlu0 %v273_v39 }
 0x30d   :  { %278 = vadd.xlane.f32.xlu1 %v277_v41 }
 0x34b   :  { %v295_v42 = vpop.permute.xlu1 %294  ;;  %v314_v44 = vpop.permute.xlu0 %313 }
 0x34c   :  { %v297_v43 = vsel %vm97_vm1, %v295_v42, 0.0  ;;  %v316_v46 = vsel %vm97_vm1, %v314_v44, 0.0 }
 0x34d   :  { %298 = vadd.xlane.f32.xlu0 %v297_v43 }
 0x34f   :  { %v333_v45 = vpop.permute.xlu1 %332 }
 0x350   :  { %v335_v48 = vsel %vm97_vm1, %v333_v45, 0.0 }
 0x351   :  { %317 = vadd.xlane.f32.xlu0 %v316_v46 }
 0x353   :  { %v287_v47 = vpop.permute.xlu1 %286 }
 0x354   :  { %v289_v50 = vsel %vm97_vm1, %v287_v47, 0.0 }
 0x355   :  { %336 = vadd.xlane.f32.xlu0 %v335_v48 }
 0x357   :  { %v306_v49 = vpop.permute.xlu1 %305 }
 0x358   :  { %v308_v53 = vsel %vm97_vm1, %v306_v49, 0.0 }
 0x359   :  { %290 = vadd.xlane.f32.xlu0 %v289_v50 }
 0x35b   :  { %v325_v51 = vpop.permute.xlu1 %324 }
 0x35c   :  { %v327_v52 = vsel %vm97_vm1, %v325_v51, 0.0 }
 0x35d   :  { %328 = vadd.xlane.f32.xlu1 %v327_v52  ;;  %309 = vadd.xlane.f32.xlu0 %v308_v53 }
 0x385   :  { %v275_v54 = vpop.xlane.xlu0 %274 }
 0x39a   :  { %v279_v56 = vpop.xlane.xlu1 %278 }
 0x3da   :  { %v299_v55 = vpop.xlane.xlu0 %298 }
 0x3db   :  { %v338_v58 = vmax.f32 %v279_v56, %v299_v55 }
 0x3de   :  { %v318_v57 = vpop.xlane.xlu0 %317 }
 0x3df   :  { %v339_v59 = vmax.f32 %v338_v58, %v318_v57 }
 0x3e2   :  { %v337_v60 = vpop.xlane.xlu0 %336 }
 0x3e3   :  { %v340_v61 = vmax.f32 %v339_v59, %v337_v60 }
 0x3e5   :  { %v341_v62 = vsub.f32 %v279_v56, %v340_v61  ;;  %v344_v63 = vsub.f32 %v299_v55, %v340_v61  ;;  %v347_v0 = vsub.f32 %v318_v57, %v340_v61  ;;  %v350_v1 = vsub.f32 %v337_v60, %v340_v61 }
 0x3e6   :  { %v291_v11 = vpop.xlane.xlu0 %290 }
 0x3e7   :  { %v342_v2 = vmul.f32 1.442695, %v341_v62  ;;  %v345_v3 = vmul.f32 1.442695, %v344_v63  ;;  %v348_v4 = vmul.f32 1.442695, %v347_v0 }
 0x3e8   :  { %v351_v5 = vmul.f32 1.442695, %v350_v1 }
 0x3e9   :  { %432 = vpow2.f32 %v342_v2 }
 0x3ea   :  { %434 = vpow2.f32 %v345_v3  ;;  %v310_v17 = vpop.xlane.xlu0 %309  ;;  %v329_v20 = vpop.xlane.xlu1 %328 }
 0x3eb   :  { %436 = vpow2.f32 %v348_v4 }
 0x3ec   :  { %438 = vpow2.f32 %v351_v5 }
 0x3f3   :  { %v433_v6 = vpop.eup %432 }
 0x3f4   :  { %v435_v7 = vpop.eup %434  ;;  %v357_v13 = vmul.f32 %v433_v6, %v275_v54 }
 0x3f5   :  { %v353_v8 = vadd.f32 %v435_v7, %v433_v6  ;;  %v437_v9 = vpop.eup %436  ;;  %v358_v14 = vmul.f32 %v435_v7, %v291_v11 }
 0x3f6   :  { %v439_v12 = vpop.eup %438  ;;  %v360_v18 = vmul.f32 %v437_v9, %v310_v17 }
 0x3f7   :  { %v354_v10 = vadd.f32 %v437_v9, %v353_v8  ;;  %v359_v16 = vadd.f32 %v358_v14, %v357_v13  ;;  %v362_v21 = vmul.f32 %v439_v12, %v329_v20 }
 0x3f9   :  { %v355_v15 = vadd.f32 %v439_v12, %v354_v10  ;;  %v361_v19 = vadd.f32 %v360_v18, %v359_v16 }
 0x3fb   :  { %440 = vrcp.f32 %v355_v15  ;;  %v363_v22 = vadd.f32 %v362_v21, %v361_v19 }
 0x405   :  { %v441_v23 = vpop.eup %440 }
 0x406   :  { %v364_v25 = vmul.f32 %v441_v23, %v363_v22 }
 0x408   :  { %v366_v27 = vadd.f32 %v365_v24, %v364_v25 }
 0x40a   :  { %v368_v28 = vadd.f32 %v367_v26, %v366_v27 }
 0x40c   :  { %370 = vst.msk [vmem:[%s681_s7] sm:$0xff] %vm369_vm2, %v368_v28 }
 0x40d   :  { %375 = vsyncpa [#allocation3], 1 }
 0x40e   :  { %376 = vsyncpa [#allocation5], 1 }
 0x40f   :  { %377 = vsyncpa [#allocation8], 1 }

</bundles_post_ra>
